<compile_context>
chip_gen: v6e
topology: v6e:2x2x1
jax: 0.10.0
libtpu: 0.0.40
codegen_flags: <defaults>
</compile_context>

<pallas_src>
from functools import partial

import jax
import jax.numpy as jnp
from jax.experimental import pallas as pl
from jax.experimental.pallas import tpu as pltpu


# ---------------------------------------------------------------------------
# Kernels
# ---------------------------------------------------------------------------

def _l2norm_lastdim_kernel(norm_eps, eps, groups, x_ref, o_ref):
    """Normalize each row of a (tm, D) tile along the lane (last) axis.

    groups > 1: each contiguous chunk of D//groups lanes is normalized
    independently, in-kernel, so the block stays full-width / lane-dense.
    """
    x = x_ref[...].astype(jnp.float32)                    # (tm, D)
    d = x.shape[-1]
    dg = d // groups
    for g in range(groups):                               # static unroll
        xg = x if groups == 1 else x[:, g * dg:(g + 1) * dg]
        ss = jnp.sum(xg * xg, axis=-1, keepdims=True)     # (tm, 1)
        if norm_eps == 0.0:
            # F.normalize(p=2, eps=1e-12): x / max(||x||, 1e-12)
            scale = jax.lax.rsqrt(jnp.maximum(ss, 1e-24))
        else:
            norm = jnp.sqrt(ss)
            target = jnp.clip(norm, 1.0 - norm_eps, 1.0 + norm_eps)
            # (tm,1) reciprocal (EUP) + broadcast multiply, not a tile-wide divide
            scale = pl.reciprocal(jnp.maximum(norm / target, eps))
        out = (xg * scale).astype(o_ref.dtype)
        if groups == 1:
            o_ref[...] = out
        else:
            o_ref[:, g * dg:(g + 1) * dg] = out


def _l2norm_sublane_kernel(norm_eps, eps, groups, x_ref, o_ref):
    """Normalize a (bm, N, D) tile along the sublane (N, second-to-last) axis."""
    x = x_ref[...].astype(jnp.float32)                    # (bm, N, D)
    n = x.shape[1]
    ng = n // groups
    for g in range(groups):
        xg = x if groups == 1 else x[:, g * ng:(g + 1) * ng, :]
        ss = jnp.sum(xg * xg, axis=1, keepdims=True)      # (bm, 1, D)
        if norm_eps == 0.0:
            scale = jax.lax.rsqrt(jnp.maximum(ss, 1e-24))
        else:
            norm = jnp.sqrt(ss)
            target = jnp.clip(norm, 1.0 - norm_eps, 1.0 + norm_eps)
            scale = pl.reciprocal(jnp.maximum(norm / target, eps))
        out = (xg * scale).astype(o_ref.dtype)
        if groups == 1:
            o_ref[...] = out
        else:
            o_ref[:, g * ng:(g + 1) * ng, :] = out


# ---------------------------------------------------------------------------
# Generation-aware tile sizing
# ---------------------------------------------------------------------------

_MIN_GRID_STEPS = 4      # keep >= 4 grid steps so v7x's two TCs both get work


def _sublane_align(dtype):
    itemsize = jnp.dtype(dtype).itemsize
    if itemsize >= 4:
        return 8
    if itemsize == 2:
        return 16
    return 32


def _vmem_capacity_bytes():
    try:
        info = pltpu.get_tpu_info()
        cap = getattr(info, "vmem_capacity_bytes", None)
        if cap:
            return int(cap)
    except Exception:
        pass
    return 64 * 1024 * 1024          # conservative (v7x-sized) fallback


def _scoped_vmem_limit():
    # ~25% headroom on physical VMEM, never ask for more than 100 MiB
    return int(min(_vmem_capacity_bytes() * 3 // 4, 100 * 1024 * 1024))


def _choose_tile(T, per_row_bytes, align, budget, min_steps=_MIN_GRID_STEPS):
    """Largest row tile whose resident footprint fits `budget`, rounded to the
    sublane packing and capped so the grid keeps at least `min_steps` steps."""
    tm = max(align, budget // max(1, per_row_bytes))
    if min_steps > 1 and T > min_steps * align:
        tm = min(tm, pl.cdiv(T, min_steps))
    if tm >= T:
        return T                      # full extent block (always legal)
    return max(align, (tm // align) * align)


# ---------------------------------------------------------------------------
# Wrappers
# ---------------------------------------------------------------------------

def _l2norm_lastdim(t, norm_eps, eps, groups, tm):
    D = t.shape[-1]
    assert D % groups == 0, "groups must divide the normalized dim"
    x2d = t.reshape(-1, D)
    T = x2d.shape[0]

    itemsize = jnp.dtype(x2d.dtype).itemsize
    align = _sublane_align(x2d.dtype)
    vmem_limit = _scoped_vmem_limit()
    budget = int(vmem_limit * 0.85)
    # resident per step: 2x double-buffered in + 2x out (io dtype) + ~2 f32 temps
    per_row = D * (4 * itemsize + 2 * 4)
    if tm is None:
        tm = _choose_tile(T, per_row, align, budget)

    out = pl.pallas_call(
        partial(_l2norm_lastdim_kernel, norm_eps, eps, groups),
        out_shape=jax.ShapeDtypeStruct((T, D), x2d.dtype),
        grid_spec=pltpu.PrefetchScalarGridSpec(
            num_scalar_prefetch=0,
            grid=(pl.cdiv(T, tm),),
            in_specs=[pl.BlockSpec((tm, D), lambda i: (i, 0))],
            out_specs=pl.BlockSpec((tm, D), lambda i: (i, 0)),
        ),
        compiler_params=pltpu.CompilerParams(
            dimension_semantics=("parallel",),
            vmem_limit_bytes=vmem_limit,
        ),
    )(x2d)
    return out.reshape(t.shape)


def _l2norm_axis_m2(t, norm_eps, eps, groups, bm):
    # normalized axis is the second-to-last: reduce along the sublane axis
    N, D = t.shape[-2], t.shape[-1]
    assert N % groups == 0, "groups must divide the normalized dim"
    x3d = t.reshape(-1, N, D)
    B = x3d.shape[0]

    itemsize = jnp.dtype(x3d.dtype).itemsize
    vmem_limit = _scoped_vmem_limit()
    budget = int(vmem_limit * 0.85)
    per_row = N * D * (4 * itemsize + 2 * 4)
    if bm is None:
        bm = _choose_tile(B, per_row, 1, budget)

    out = pl.pallas_call(
        partial(_l2norm_sublane_kernel, norm_eps, eps, groups),
        out_shape=jax.ShapeDtypeStruct((B, N, D), x3d.dtype),
        grid_spec=pltpu.PrefetchScalarGridSpec(
            num_scalar_prefetch=0,
            grid=(pl.cdiv(B, bm),),
            in_specs=[pl.BlockSpec((bm, N, D), lambda i: (i, 0, 0))],
            out_specs=pl.BlockSpec((bm, N, D), lambda i: (i, 0, 0)),
        ),
        compiler_params=pltpu.CompilerParams(
            dimension_semantics=("parallel",),
            vmem_limit_bytes=vmem_limit,
        ),
    )(x3d)
    return out.reshape(t.shape)


def l2norm_pallas(t, *, dim=-1, norm_eps=0.0, eps=None, groups=1, tm=None):
    """Forward pass of nGPT L2Norm. Normalizes `t` to unit L2 norm along `dim`."""
    ndim = t.ndim
    ax = dim % ndim
    if eps is None:
        eps = 1e-5 if jnp.dtype(t.dtype) == jnp.float16 else 1e-10
    norm_eps = float(norm_eps)
    eps = float(eps)

    if ax == ndim - 1:
        return _l2norm_lastdim(t, norm_eps, eps, groups, tm)
    if ndim >= 2 and ax == ndim - 2:
        return _l2norm_axis_m2(t, norm_eps, eps, groups, tm)
    # rare general case: extra transpose pass (one HBM round-trip each way)
    t_m = jnp.moveaxis(t, ax, -1)
    out = _l2norm_lastdim(t_m, norm_eps, eps, groups, tm)
    return jnp.moveaxis(out, -1, ax)


# ---------------------------------------------------------------------------
# Demo / self-test
# ---------------------------------------------------------------------------

if __name__ == "__main__":
    # shapes consistent with the module: (batch, seq, dim), normalize dim=-1
    batch, seq, dim = 2, 8, 256   # dim multiple of 128 -> lane-dense loads/stores

    key = jax.random.PRNGKey(0)
    t = jax.random.normal(key, (batch, seq, dim), dtype=jnp.float32)

    # L2Norm() defaults: dim=-1, norm_eps=0.0, groups=1
    out = l2norm_pallas(t)
    jax.block_until_ready(out)
    ref = t / jnp.maximum(jnp.linalg.norm(t, axis=-1, keepdims=True), 1e-12)
    assert jnp.allclose(out, ref, atol=1e-5, rtol=1e-5), "default branch mismatch"

    # norm_eps > 0 branch
    out_eps = l2norm_pallas(t, norm_eps=0.1)
    jax.block_until_ready(out_eps)
    n = jnp.linalg.norm(t, axis=-1, keepdims=True)
    tgt = jnp.clip(n, 0.9, 1.1)
    ref_eps = t / jnp.maximum(n / tgt, 1e-10)
    assert jnp.allclose(out_eps, ref_eps, atol=1e-5, rtol=1e-5), "norm_eps branch mismatch"

    # groups > 1 branch (handled in-kernel on full-width blocks)
    out_g = l2norm_pallas(t, groups=2)
    jax.block_until_ready(out_g)
    tg = t.reshape(batch, seq, 2, dim // 2)
    ref_g = (tg / jnp.maximum(jnp.linalg.norm(tg, axis=-1, keepdims=True), 1e-12)
             ).reshape(batch, seq, dim)
    assert jnp.allclose(out_g, ref_g, atol=1e-5, rtol=1e-5), "groups branch mismatch"

    # dim = -2 branch (in-kernel sublane reduction, no moveaxis pass)
    out_ax = l2norm_pallas(t, dim=1)
    jax.block_until_ready(out_ax)
    ref_ax = t / jnp.maximum(jnp.linalg.norm(t, axis=1, keepdims=True), 1e-12)
    assert jnp.allclose(out_ax, ref_ax, atol=1e-5, rtol=1e-5), "dim=-2 branch mismatch"

    print("KERNEL_OK")
</pallas_src>

<mosaic_0001>
module attributes {stable_mosaic.version = 11 : i64} {
  func.func @_l2norm_lastdim_kernel(%arg0: i32, %arg1: memref<16x256xf32, #tpu.memory_space<vmem>>, %arg2: memref<16x256xf32, #tpu.memory_space<vmem>>) attributes {dimension_semantics = [#tpu.dimension_semantics<parallel>], iteration_bounds = array<i64: 1>, scalar_prefetch = 0 : i64, scratch_operands = 0 : i64, tpu.core_type = #tpu.core_type<tc>, window_params = [{transform_indices = @transform_0, window_bounds = array<i64: 16, 256>}, {transform_indices = @transform_1, window_bounds = array<i64: 16, 256>}]} {
    %c0 = arith.constant 0 : index
    %c0_0 = arith.constant 0 : index
    %0 = vector.load %arg1[%c0, %c0_0] : memref<16x256xf32, #tpu.memory_space<vmem>>, vector<16x256xf32>
    %1 = arith.mulf %0, %0 : vector<16x256xf32>
    %cst = arith.constant dense<0.000000e+00> : vector<16xf32>
    %2 = vector.multi_reduction <add>, %1, %cst [1] : vector<16x256xf32> to vector<16xf32>
    %3 = vector.shape_cast %2 : vector<16xf32> to vector<16x1xf32>
    %cst_1 = arith.constant 1.000000e-24 : f32
    %4 = vector.broadcast %cst_1 : f32 to vector<16x1xf32>
    %5 = arith.maximumf %3, %4 : vector<16x1xf32>
    %6 = math.rsqrt %5 : vector<16x1xf32>
    %7 = vector.broadcast %6 : vector<16x1xf32> to vector<16x256xf32>
    %8 = arith.mulf %0, %7 : vector<16x256xf32>
    %c0_2 = arith.constant 0 : index
    %c0_3 = arith.constant 0 : index
    %9 = vector.load %arg2[%c0_2, %c0_3] : memref<16x256xf32, #tpu.memory_space<vmem>>, vector<16x256xf32>
    tpu.vector_store %arg2[%c0_2, %c0_3], %8 {strides = array<i32>} : memref<16x256xf32, #tpu.memory_space<vmem>>, vector<16x256xf32>,
    return
  }
  func.func @transform_0(%arg0: i32) -> (i32, i32) {
    %c0_i32 = arith.constant 0 : i32
    %c0_i32_0 = arith.constant 0 : i32
    return %arg0, %c0_i32 : i32, i32
  }
  func.func @transform_1(%arg0: i32) -> (i32, i32) {
    %c0_i32 = arith.constant 0 : i32
    %c0_i32_0 = arith.constant 0 : i32
    return %arg0, %c0_i32 : i32, i32
  }
}

</mosaic_0001>

<bundles_post_ra>
// kernel: tpu_custom_call.1
= control target key start
LH: loop header
LB: loop body
LE: loop exit
PB: predicated region body
PF: predicated region fallthrough
CT: control target
= control target key end

     0   :  { %6 = vsyncpa [#allocation3], 0  ;;  %s144_s0 = inlined_call_operand.hbm [shape: f32[16,256], index: 0, kind: input, shape index: {}]   ;;  %s145_s1 = inlined_call_operand.hbm [shape: f32[16,256], index: 1, kind: output, shape index: {}]  }
   0x1   :  { %7 = vsyncpa [#allocation4], 0  ;;  %s118_s6 = smov [#allocation2]  }
   0x2   :  { %s13_s7 = sshll.u32 %s118_s6, 4  ;;  %s14_s7 = int_to_ptr.vmem [resolvable:$true] %s13_s7 }
   0x3   :  { %s82_s8 = scalar_lea.vmem %s14_s7, 512  ;;  %p87_p1 = scmp.lt.s32.totalorder %s14_s7, %s14_s7 }
   0x4   :  { %p83_p0 = scmp.ne.s32.totalorder %s14_s7, %s82_s8  ;;  %p88_p2 = scmp.lt.s32.totalorder %s82_s8, %s82_s8 }
   0x6   :  { %p89_p3 = por %p88_p2, %p87_p1 }
   0x8   :  { %p90_p4 = pnand %p89_p3, %p83_p0 }
   0xa   :  { %93 = shalt.err (!%p90_p4)
}
   0xb   :  { %s119_s9 = smov 256   ;;  %s120_s10 = smov 16  }
   0xc   :  { %19 = dma.hbm_to_vmem [thread:$0]  %s144_s0, 512, %s14_s7, [#allocation3], %s119_s9, %s119_s9, %s120_s10  }
   0xd   :  { %114 = dma.done.wait [#allocation3], 512  }
   0xe   :  { %115 = vsyncadd [#allocation3], 4294966784  ;;  %v23_v0 = vld [vmem:[#allocation2] sm:$0xff]  ;;  %v24_v1 = vld [vmem:[#allocation2 + $0x8] sm:$0xff]  ;;  %s121_s0 = smov [#allocation5]  }
   0xf   :  { %v25_v2 = vld [vmem:[#allocation2 + $0x10] sm:$0xff]  ;;  %v27_v3 = vmul.f32 %v23_v0, %v23_v0  ;;  %v28_v4 = vmul.f32 %v24_v1, %v24_v1  ;;  %v26_v5 = vld [vmem:[#allocation2 + $0x18] sm:$0xff]  ;;  %s54_s13 = sshll.u32 %s121_s0, 4  ;;  %s55_s13 = int_to_ptr.vmem [resolvable:$true] %s54_s13 }
  0x10   :  { %v29_v6 = vmul.f32 %v25_v2, %v25_v2  ;;  %v30_v7 = vmul.f32 %v26_v5, %v26_v5  ;;  %s94_s14 = scalar_lea.vmem %s55_s13, 512  ;;  %p99_p6 = scmp.lt.s32.totalorder %s55_s13, %s55_s13 }
  0x11   :  { %v31_v8 = vadd.f32 %v28_v4, %v27_v3  ;;  %p95_p5 = scmp.ne.s32.totalorder %s55_s13, %s94_s14  ;;  %p100_p7 = scmp.lt.s32.totalorder %s94_s14, %s94_s14 }
  0x12   :  { %v34_v9 = vadd.f32 %v30_v7, %v29_v6 }
  0x13   :  { %32 = vadd.xlane.f32.xlu0 %v31_v8  ;;  %p101_p8 = por %p100_p7, %p99_p6 }
  0x15   :  { %p102_p9 = pnand %p101_p8, %p95_p5 }
  0x17   :  { %35 = vadd.xlane.f32.xlu0 %v34_v9 }
  0x9c   :  { %v33_v10 = vpop.xlane.xlu0 %32 }
  0x9d   :  { %v37_v11 = vmax.f32 %v33_v10, 1e-24 }
  0x9f   :  { %70 = vrsqrt.f32 %v37_v11 }
  0xa0   :  { %v36_v12 = vpop.xlane.xlu0 %35 }
  0xa1   :  { %v38_v13 = vmax.f32 %v36_v12, 1e-24 }
  0xa3   :  { %72 = vrsqrt.f32 %v38_v13 }
  0xac   :  { %v71_v14 = vpop.eup %70 }
  0xad   :  { %v41_v15 = vmul.f32 %v71_v14, %v23_v0  ;;  %v42_v16 = vmul.f32 %v71_v14, %v24_v1 }
  0xaf   :  { %45 = vst [vmem:[#allocation5] sm:$0xff] %v41_v15  ;;  %46 = vst [vmem:[#allocation5 + $0x8] sm:$0xff] %v42_v16 }
  0xb0   :  { %v73_v17 = vpop.eup %72 }
  0xb1   :  { %v43_v18 = vmul.f32 %v73_v17, %v25_v2  ;;  %v44_v19 = vmul.f32 %v73_v17, %v26_v5 }
  0xb3   :  { %47 = vst [vmem:[#allocation5 + $0x10] sm:$0xff] %v43_v18  ;;  %48 = vst [vmem:[#allocation5 + $0x18] sm:$0xff] %v44_v19 }
  0xb4   :  { %105 = shalt.err (!%p102_p9)
}
  0xb5   :  { %60 = dma.vmem_to_hbm [thread:$0]  %s55_s13, 512, %s145_s1, [#allocation4], %s119_s9, %s119_s9, %s120_s10  }
  0xb6   :  { %116 = dma.done.wait [#allocation4], 512  }
  0xb7   :  { %117 = vsyncadd [#allocation4], 4294966784 }
  0xb8   :  { %64 = vsyncpa [#allocation3], 1 }
  0xb9   :  { %65 = vsyncpa [#allocation4], 1 }

</bundles_post_ra>
